<compile_context>
chip_gen: v7x
topology: tpu7x:2x2x1
jax: 0.10.0
libtpu: 0.0.40
codegen_flags: <defaults>
</compile_context>

<pallas_src>
import functools

import jax
import jax.numpy as jnp
from jax.experimental import pallas as pl
from jax.experimental.pallas import tpu as pltpu


def _round_up(x, m):
    return (x + m - 1) // m * m


def _vmem_budget():
    """Per-generation (max activation rows per grid step, vmem_limit_bytes).

    v7x has only 64 MiB VMEM per TensorCore -> keep the per-step working set
    small (~4096 activation rows, 32 MiB scoped limit).  v5e/v6e have 128 MiB,
    so larger tiles amortize the ~0.35 us/step pipeline overhead.
    """
    vmem_bytes = 64 * 1024 * 1024
    try:
        vmem_bytes = int(pltpu.get_tpu_info().vmem_capacity_bytes)
    except Exception:
        pass  # conservative fallback
    if vmem_bytes >= 96 * 1024 * 1024:          # v5e / v6e (128 MiB per core)
        return 8192, 64 * 1024 * 1024
    return 4096, 32 * 1024 * 1024               # v7x (64 MiB per core)


def _pick_tile_b(batch, n_tok, max_rows):
    """Batch tile per grid step.

    The x block is (tile_b*n_tok, D_pad) and the pooled output block is
    (tile_b, H_pad); when tile_b < batch the second-to-last block dims must be
    multiples of 8, so tile_b is either `batch` (single tile) or a multiple of
    8.  max_rows bounds the per-step activation [tile_b*n_tok, H_pad] so the
    working set (plus double buffering) stays well inside the VMEM limit.
    """
    if batch < 16:
        return batch                  # cannot split into 8-aligned sub-tiles
    if batch * n_tok <= max_rows:
        tb = batch
    else:
        tb = max(8, (max_rows // max(n_tok, 1)) // 8 * 8)
    # Guarantee >= 2 grid steps so the "parallel" batch axis can shard across
    # v7x's two TensorCores (neutral on single-TC v5e/v6e).
    tb = min(tb, max(8, _round_up(pl.cdiv(batch, 2), 8)))
    return min(tb, batch)


def _rgp_mlp_pool_kernel(num_layers, tile_b, n_tok, mxu_dtype, *refs):
    """Point-wise MLP + per-batch max pool for one batch tile.

    refs = (x_ref, w0, b0, w1, b1, ..., pooled_ref)
      x_ref:      [tile_b * n_tok, D_pad]   f32
      wl:         [D_pad|H_pad, H_pad]      mxu_dtype  (resident VMEM)
      bl:         [1, H_pad]                f32        (resident VMEM)
      pooled_ref: [tile_b, H_pad]           f32        (lane-dense output)
    """
    x_ref = refs[0]
    pooled_ref = refs[-1]
    layer_refs = refs[1:-1]

    # All layers run on the MXU (layer 0 has K zero-padded to 8): the MXU has
    # large slack here, which keeps the binding VPU/store slots free.
    h = x_ref[...].astype(mxu_dtype)
    for l in range(num_layers):
        w = layer_refs[2 * l][...]
        b = layer_refs[2 * l + 1][...]
        acc = jnp.maximum(
            jnp.dot(h, w, preferred_element_type=jnp.float32) + b, 0.0)
        # Keep activations in mxu_dtype between layers (downcast fused into
        # the ReLU output); the last layer stays f32 for the max pool.
        # These casts are no-ops on the exact f32 path.
        h = acc if l == num_layers - 1 else acc.astype(mxu_dtype)

    # Per-batch max pool: one grouped sublane reduce + a single dense store
    # (no per-row masked vst.msk).  n_tok is a multiple of 8, so the reshape
    # is (8,128)-tile aligned and the axis-1 reduce is a native sublane reduce.
    pooled_ref[...] = jnp.max(h.reshape(tile_b, n_tok, h.shape[-1]), axis=1)


def rgp_forward(radar_points, params, *, mxu_dtype=jnp.bfloat16,
                use_token_mixing=False):
    """radar_points: [B, N, D] float32. Returns (mean [B, 2], cov [B, 2, 2])."""
    if use_token_mixing:
        # TODO(synk): MixerBlock stack + farthest point sampling branch is not
        # implemented (not used by the default config); fail loudly.
        raise NotImplementedError("use_token_mixing=True is not implemented")

    B, N, D = radar_points.shape
    mlp = params["mlp"]
    num_layers = len(mlp)
    H = mlp[-1][0].shape[1]
    H_pad = _round_up(max(H, 128), 128)   # lane-dense hidden width (don't over-pad)
    D_pad = _round_up(max(D, 8), 8)       # MXU K padding + denser x rows in VMEM
    N_pad = _round_up(N, 8)               # sublane-aligned per-batch pool groups

    x = radar_points.astype(jnp.float32)
    if N_pad != N:
        # Replicate the last real token so the per-batch max is unchanged
        # (token mask is all ones on this path).
        pad = jnp.broadcast_to(x[:, N - 1:N, :], (B, N_pad - N, D))
        x = jnp.concatenate([x, pad], axis=1)
    if D_pad != D:
        x = jnp.pad(x, ((0, 0), (0, 0), (0, D_pad - D)))
    x = x.reshape(B * N_pad, D_pad)

    max_rows, vmem_limit = _vmem_budget()
    tile_b = _pick_tile_b(B, N_pad, max_rows)
    num_tiles = pl.cdiv(B, tile_b)

    ins = [x]
    in_specs = [pl.BlockSpec((tile_b * N_pad, D_pad), lambda i: (i, 0))]

    def resident(shape):
        # Same block every grid step -> stays resident in VMEM (no re-DMA).
        return pl.BlockSpec(shape, lambda i: (0, 0))

    for l, (w, b) in enumerate(mlp):
        w = w.astype(jnp.float32)
        in_pad = D_pad if l == 0 else H_pad
        wp = jnp.zeros((in_pad, H_pad), jnp.float32)
        wp = wp.at[:w.shape[0], :w.shape[1]].set(w)
        # mxu_dtype weights halve DMA bytes (bf16) and hit the bf16 MXU fast
        # path; accumulation stays f32 via preferred_element_type.
        wp = wp.astype(mxu_dtype)
        bp = jnp.zeros((1, H_pad), jnp.float32)
        bp = bp.at[0, :b.shape[0]].set(b.astype(jnp.float32))
        ins += [wp, bp]
        in_specs += [resident(wp.shape), resident(bp.shape)]

    kernel = functools.partial(_rgp_mlp_pool_kernel, num_layers, tile_b, N_pad,
                               mxu_dtype)

    pooled_pad = pl.pallas_call(
        kernel,
        out_shape=jax.ShapeDtypeStruct((B, H_pad), jnp.float32),
        grid=(num_tiles,),
        in_specs=in_specs,
        out_specs=pl.BlockSpec((tile_b, H_pad), lambda i: (i, 0)),
        compiler_params=pltpu.CompilerParams(
            dimension_semantics=("parallel",),
            vmem_limit_bytes=vmem_limit),
    )(*ins)

    pooled = pooled_pad[:, :H]              # drop the zero hidden padding

    # Heads + covariance epilogue: O(B*H) lane-sparse work (2/3/4-wide) stays
    # in plain XLA instead of forcing masked partial stores in the kernel.
    mean_w, mean_b = params["mean_head"]
    cov_w, cov_b = params["cov_head"]
    mean = pooled @ mean_w + mean_b
    cp = pooled @ cov_w + cov_b
    log_std = jnp.clip(cp[:, :2], -2.0, 5.0)
    rho = jnp.clip(jnp.tanh(cp[:, 2]), -0.99, 0.99)
    std = jnp.exp(log_std)
    sx, sy = std[:, 0], std[:, 1]
    c00 = sx * sx + 1e-3
    c01 = rho * sx * sy
    c11 = sy * sy + 1e-3
    cov = jnp.stack([jnp.stack([c00, c01], axis=1),
                     jnp.stack([c01, c11], axis=1)], axis=1)
    return mean, cov


def init_params(key, input_dim, hidden_dim, num_layers):
    """Deterministic parameter init mirroring the PyTorch module's shapes."""
    params = {"mlp": []}
    in_dim = input_dim
    for _ in range(num_layers):
        key, kw, kb = jax.random.split(key, 3)
        bound = 1.0 / jnp.sqrt(in_dim)
        w = jax.random.uniform(kw, (in_dim, hidden_dim), jnp.float32, -bound, bound)
        b = jax.random.uniform(kb, (hidden_dim,), jnp.float32, -bound, bound)
        params["mlp"].append((w, b))
        in_dim = hidden_dim

    key, kw, kb = jax.random.split(key, 3)
    bound = 1.0 / jnp.sqrt(hidden_dim)
    params["mean_head"] = (
        jax.random.uniform(kw, (hidden_dim, 2), jnp.float32, -bound, bound),
        jax.random.uniform(kb, (2,), jnp.float32, -bound, bound),
    )
    key, kw = jax.random.split(key)
    # cov_head: normal(std=0.001) weight, bias = [-1, -1, 0] (nn.init.constant_)
    params["cov_head"] = (
        0.001 * jax.random.normal(kw, (hidden_dim, 3), jnp.float32),
        jnp.array([-1.0, -1.0, 0.0], jnp.float32),
    )
    return params


def rgp_forward_reference(radar_points, params):
    """Pure-JAX f32 reference matching the PyTorch module."""
    B, N, D = radar_points.shape
    h = radar_points.reshape(B * N, D)
    for (w, b) in params["mlp"]:
        h = jnp.maximum(h @ w + b, 0.0)
    pooled = jnp.max(h.reshape(B, N, -1), axis=1)
    mean = pooled @ params["mean_head"][0] + params["mean_head"][1]
    cp = pooled @ params["cov_head"][0] + params["cov_head"][1]
    log_std = jnp.clip(cp[:, :2], -2.0, 5.0)
    rho = jnp.clip(jnp.tanh(cp[:, 2]), -0.99, 0.99)
    std = jnp.exp(log_std)
    sx, sy = std[:, 0], std[:, 1]
    c00 = sx * sx + 1e-3
    c01 = rho * sx * sy
    c11 = sy * sy + 1e-3
    cov = jnp.stack([jnp.stack([c00, c01], axis=1),
                     jnp.stack([c01, c11], axis=1)], axis=1)
    return mean, cov


def _check(radar_points, params, *, f32_tol, bf16_tol):
    mean_ref, cov_ref = rgp_forward_reference(radar_points, params)

    # 1) exact-math path (f32 on the MXU): must match the reference tightly
    fwd_f32 = jax.jit(functools.partial(rgp_forward, mxu_dtype=jnp.float32))
    mean32, cov32 = fwd_f32(radar_points, params)
    jax.block_until_ready((mean32, cov32))
    assert jnp.allclose(mean32, mean_ref, atol=f32_tol, rtol=f32_tol)
    assert jnp.allclose(cov32, cov_ref, atol=f32_tol, rtol=f32_tol)

    # 2) recommended fast path (bf16 MXU inputs/activations, f32 accumulate)
    fwd_bf16 = jax.jit(functools.partial(rgp_forward, mxu_dtype=jnp.bfloat16))
    mean, cov = fwd_bf16(radar_points, params)
    jax.block_until_ready((mean, cov))
    assert jnp.allclose(mean, mean_ref, atol=bf16_tol, rtol=bf16_tol)
    assert jnp.allclose(cov, cov_ref, atol=bf16_tol, rtol=bf16_tol)


if __name__ == "__main__":
    key = jax.random.PRNGKey(0)

    # Config 1: default small shapes -- batch=2, N=8 radar points, D=2 (x,
    # depth), rgp_hidden_dim=32, rgp_num_layers=2.
    B, N, D = 2, 8, 2
    key, kx, kp = jax.random.split(key, 3)
    radar_points = jax.random.normal(kx, (B, N, D), jnp.float32)
    params = init_params(kp, D, 32, 2)
    _check(radar_points, params, f32_tol=1e-5, bf16_tol=2e-2)

    # Config 2: N not a multiple of 8 (exercises token replication padding),
    # B not divisible by tile_b (partial last grid tile, >= 2 grid steps),
    # 3 MLP layers.
    B2, N2, D2 = 20, 7, 2
    key, kx2, kp2 = jax.random.split(key, 3)
    radar_points2 = jax.random.normal(kx2, (B2, N2, D2), jnp.float32)
    params2 = init_params(kp2, D2, 32, 3)
    _check(radar_points2, params2, f32_tol=1e-4, bf16_tol=5e-2)

    print("KERNEL_OK")
</pallas_src>

<mosaic_0001>
module attributes {stable_mosaic.version = 11 : i64} {
  func.func @_rgp_mlp_pool_kernel(%arg0: i32, %arg1: memref<16x8xf32, #tpu.memory_space<vmem>>, %arg2: memref<8x128xf32, #tpu.memory_space<vmem>>, %arg3: memref<1x128xf32, #tpu.memory_space<vmem>>, %arg4: memref<128x128xf32, #tpu.memory_space<vmem>>, %arg5: memref<1x128xf32, #tpu.memory_space<vmem>>, %arg6: memref<2x128xf32, #tpu.memory_space<vmem>>) attributes {dimension_semantics = [#tpu.dimension_semantics<parallel>], iteration_bounds = array<i64: 1>, scalar_prefetch = 0 : i64, scratch_operands = 0 : i64, tpu.core_type = #tpu.core_type<tc>, window_params = [{transform_indices = @transform_0, window_bounds = array<i64: 16, 8>}, {pipeline_mode = #tpu.pipeline_mode<synchronous>, transform_indices = @transform_1, window_bounds = array<i64: 8, 128>}, {pipeline_mode = #tpu.pipeline_mode<synchronous>, transform_indices = @transform_2, window_bounds = array<i64: 1, 128>}, {pipeline_mode = #tpu.pipeline_mode<synchronous>, transform_indices = @transform_3, window_bounds = array<i64: 128, 128>}, {pipeline_mode = #tpu.pipeline_mode<synchronous>, transform_indices = @transform_4, window_bounds = array<i64: 1, 128>}, {transform_indices = @transform_5, window_bounds = array<i64: 2, 128>}]} {
    %c0 = arith.constant 0 : index
    %c0_0 = arith.constant 0 : index
    %0 = vector.load %arg1[%c0, %c0_0] : memref<16x8xf32, #tpu.memory_space<vmem>>, vector<16x8xf32>
    %c0_1 = arith.constant 0 : index
    %c0_2 = arith.constant 0 : index
    %1 = vector.load %arg2[%c0_1, %c0_2] : memref<8x128xf32, #tpu.memory_space<vmem>>, vector<8x128xf32>
    %c0_3 = arith.constant 0 : index
    %c0_4 = arith.constant 0 : index
    %2 = vector.load %arg3[%c0_3, %c0_4] : memref<1x128xf32, #tpu.memory_space<vmem>>, vector<1x128xf32>
    %cst = arith.constant dense<0.000000e+00> : vector<16x128xf32>
    %3 = tpu.matmul %0, %1, %cst {dimension_numbers = #tpu.dot_dimension_numbers<[1], [0], [0], [1], [0, 0, 1, 1], [], []>} : vector<16x8xf32>, vector<8x128xf32>, vector<16x128xf32> -> vector<16x128xf32>
    %4 = vector.broadcast %2 : vector<1x128xf32> to vector<16x128xf32>
    %5 = arith.addf %3, %4 : vector<16x128xf32>
    %cst_5 = arith.constant 0.000000e+00 : f32
    %6 = vector.broadcast %cst_5 : f32 to vector<16x128xf32>
    %7 = arith.maximumf %5, %6 : vector<16x128xf32>
    %c0_6 = arith.constant 0 : index
    %c0_7 = arith.constant 0 : index
    %8 = vector.load %arg4[%c0_6, %c0_7] : memref<128x128xf32, #tpu.memory_space<vmem>>, vector<128x128xf32>
    %c0_8 = arith.constant 0 : index
    %c0_9 = arith.constant 0 : index
    %9 = vector.load %arg5[%c0_8, %c0_9] : memref<1x128xf32, #tpu.memory_space<vmem>>, vector<1x128xf32>
    %cst_10 = arith.constant dense<0.000000e+00> : vector<16x128xf32>
    %10 = tpu.matmul %7, %8, %cst_10 {dimension_numbers = #tpu.dot_dimension_numbers<[1], [0], [0], [1], [0, 0, 1, 1], [], []>} : vector<16x128xf32>, vector<128x128xf32>, vector<16x128xf32> -> vector<16x128xf32>
    %11 = vector.broadcast %9 : vector<1x128xf32> to vector<16x128xf32>
    %12 = arith.addf %10, %11 : vector<16x128xf32>
    %cst_11 = arith.constant 0.000000e+00 : f32
    %13 = vector.broadcast %cst_11 : f32 to vector<16x128xf32>
    %14 = arith.maximumf %12, %13 : vector<16x128xf32>
    %15 = vector.shape_cast %14 : vector<16x128xf32> to vector<2x8x128xf32>
    %cst_12 = arith.constant dense<0xFF800000> : vector<2x128xf32>
    %16 = vector.multi_reduction <maximumf>, %15, %cst_12 [1] : vector<2x8x128xf32> to vector<2x128xf32>
    %c0_13 = arith.constant 0 : index
    %c0_14 = arith.constant 0 : index
    %17 = vector.load %arg6[%c0_13, %c0_14] : memref<2x128xf32, #tpu.memory_space<vmem>>, vector<2x128xf32>
    tpu.vector_store %arg6[%c0_13, %c0_14], %16 {strides = array<i32>} : memref<2x128xf32, #tpu.memory_space<vmem>>, vector<2x128xf32>,
    return
  }
  func.func @transform_0(%arg0: i32) -> (i32, i32) {
    %c0_i32 = arith.constant 0 : i32
    %c0_i32_0 = arith.constant 0 : i32
    return %arg0, %c0_i32 : i32, i32
  }
  func.func @transform_1(%arg0: i32) -> (i32, i32) {
    %c0_i32 = arith.constant 0 : i32
    %c0_i32_0 = arith.constant 0 : i32
    %c0_i32_1 = arith.constant 0 : i32
    return %c0_i32, %c0_i32_0 : i32, i32
  }
  func.func @transform_2(%arg0: i32) -> (i32, i32) {
    %c0_i32 = arith.constant 0 : i32
    %c0_i32_0 = arith.constant 0 : i32
    %c0_i32_1 = arith.constant 0 : i32
    return %c0_i32, %c0_i32_0 : i32, i32
  }
  func.func @transform_3(%arg0: i32) -> (i32, i32) {
    %c0_i32 = arith.constant 0 : i32
    %c0_i32_0 = arith.constant 0 : i32
    %c0_i32_1 = arith.constant 0 : i32
    return %c0_i32, %c0_i32_0 : i32, i32
  }
  func.func @transform_4(%arg0: i32) -> (i32, i32) {
    %c0_i32 = arith.constant 0 : i32
    %c0_i32_0 = arith.constant 0 : i32
    %c0_i32_1 = arith.constant 0 : i32
    return %c0_i32, %c0_i32_0 : i32, i32
  }
  func.func @transform_5(%arg0: i32) -> (i32, i32) {
    %c0_i32 = arith.constant 0 : i32
    %c0_i32_0 = arith.constant 0 : i32
    return %arg0, %c0_i32 : i32, i32
  }
}

</mosaic_0001>

<bundles_post_ra>
// kernel: rgp_forward.1
= control target key start
LH: loop header
LB: loop body
LE: loop exit
PB: predicated region body
PF: predicated region fallthrough
CT: control target
= control target key end

     0   :  { %vm30_vm0 = vcmask 64512   ;;  %vm228_vm1 = vcmask 1041409   ;;  %s429_s1 = inlined_call_operand.vmem [shape: f32[8,128], index: 1, kind: input, shape index: {}]   ;;  %s430_s0 = inlined_call_operand.vmem [shape: f32[16,8], index: 0, kind: input, shape index: {}]   ;;  %s431_s3 = inlined_call_operand.vmem [shape: f32[128,128], index: 3, kind: input, shape index: {}]   ;;  %s432_s2 = inlined_call_operand.vmem [shape: f32[1,128], index: 2, kind: input, shape index: {}]   ;;  %s433_s4 = inlined_call_operand.vmem [shape: f32[1,128], index: 4, kind: input, shape index: {}]   ;;  %s434_s5 = inlined_call_operand.vmem [shape: f32[2,128], index: 5, kind: output, shape index: {}]  }
   0x1   :  { %v22_v0 = vld [vmem:[%s429_s1] sm:$0xff]  ;;  %v21_v2 = vld [vmem:[%s430_s0 + $0x8] sm:$0xff]  ;;  %v116_v5 = vld [vmem:[%s431_s3 + $0x10] sm:$0xff] }
   0x2   :  { %v20_v1 = vld [vmem:[%s430_s0] sm:$0xff]  ;;  %261 = vmatprep.subr.mxu0 %v22_v0  ;;  %v115_v4 = vld [vmem:[%s431_s3 + $0x8] sm:$0xff]  ;;  %v117_v7 = vld [vmem:[%s431_s3 + $0x18] sm:$0xff] }
   0x3   :  { %263 = vmatprep.mubr.msk.f32.mxu0 %vm30_vm0, %v20_v1  ;;  %v114_v3 = vld [vmem:[%s431_s3] sm:$0xff]  ;;  %262 = vmatpush3.msra.mxu0 %v22_v0  ;;  %v305_v8 = vpack.c.bf16 %v117_v7, %v116_v5  ;;  %v119_v10 = vld [vmem:[%s431_s3 + $0x28] sm:$0xff]  ;;  %v120_v12 = vld [vmem:[%s431_s3 + $0x30] sm:$0xff] }
   0x4   :  { %v301_v6 = vpack.c.bf16 %v115_v4, %v114_v3  ;;  %264 = vmatmul.mubr.msk.f32.vlgmr.msra.gmra.mrb[0].mxu0 %vm30_vm0, %v21_v2  ;;  %v118_v9 = vld [vmem:[%s431_s3 + $0x20] sm:$0xff]  ;;  %v121_v13 = vld [vmem:[%s431_s3 + $0x38] sm:$0xff]  ;;  %v123_v16 = vld [vmem:[%s431_s3 + $0x48] sm:$0xff] }
   0x5   :  { %v309_v11 = vpack.c.bf16 %v119_v10, %v118_v9  ;;  %v313_v14 = vpack.c.bf16 %v121_v13, %v120_v12  ;;  %v122_v15 = vld [vmem:[%s431_s3 + $0x40] sm:$0xff]  ;;  %v124_v18 = vld [vmem:[%s431_s3 + $0x50] sm:$0xff]  ;;  %v125_v19 = vld [vmem:[%s431_s3 + $0x58] sm:$0xff] }
   0x6   :  { %302 = vmatprep.subr.bf16.mxu1 %v301_v6  ;;  %v317_v17 = vpack.c.bf16 %v123_v16, %v122_v15  ;;  %v321_v20 = vpack.c.bf16 %v125_v19, %v124_v18  ;;  %v126_v21 = vld [vmem:[%s431_s3 + $0x60] sm:$0xff]  ;;  %v127_v22 = vld [vmem:[%s431_s3 + $0x68] sm:$0xff]  ;;  %v128_v24 = vld [vmem:[%s431_s3 + $0x70] sm:$0xff] }
   0x7   :  { %304 = vmatpush3.bf16.msra.mxu1 %v301_v6  ;;  %v325_v23 = vpack.c.bf16 %v127_v22, %v126_v21  ;;  %v129_v25 = vld [vmem:[%s431_s3 + $0x78] sm:$0xff]  ;;  %v236_v27 = vld [vmem:[%s432_s2] ss:$0 sm:$0xff] }
   0x8   :  { %306 = vmatprep.subr.bf16.mxu1 %v305_v8  ;;  %v329_v26 = vpack.c.bf16 %v129_v25, %v128_v24  ;;  %v239_v34 = vld [vmem:[%s433_s4] ss:$0 sm:$0xff] }
   0xb   :  { %308 = vmatpush3.bf16.msra.mxu1 %v305_v8 }
   0xc   :  { %310 = vmatprep.subr.bf16.mxu1 %v309_v11 }
   0xf   :  { %312 = vmatpush3.bf16.msra.mxu1 %v309_v11 }
  0x10   :  { %314 = vmatprep.subr.bf16.mxu1 %v313_v14 }
  0x13   :  { %316 = vmatpush3.bf16.msra.mxu1 %v313_v14 }
  0x14   :  { %318 = vmatprep.subr.bf16.mxu1 %v317_v17 }
  0x17   :  { %320 = vmatpush3.bf16.msra.mxu1 %v317_v17 }
  0x18   :  { %322 = vmatprep.subr.bf16.mxu1 %v321_v20 }
  0x1b   :  { %324 = vmatpush3.bf16.msra.mxu1 %v321_v20 }
  0x1c   :  { %326 = vmatprep.subr.bf16.mxu1 %v325_v23 }
  0x1f   :  { %328 = vmatpush3.bf16.msra.mxu1 %v325_v23 }
  0x20   :  { %330 = vmatprep.subr.bf16.mxu1 %v329_v26 }
  0x23   :  { %332 = vmatpush3.bf16.msra.mxu1 %v329_v26 }
  0xd7   :  { %v265_v28 = vpop.f32.mrb[0].mxu0 }
  0xd8   :  { %v109_v29 = vadd.f32 %v265_v28, %v236_v27  ;;  %v103_v30 = vpop.f32.mrb[1].mxu0 }
  0xd9   :  { %v104_v31 = vadd.f32 %v236_v27, %v103_v30 }
  0xda   :  { %v113_v33 = vmax.f32 %v109_v29, 0.0 }
  0xdb   :  { %v112_v32 = vmax.f32 %v104_v31, 0.0 }
  0xdd   :  { %298 = vmatprep.mubr.f32.mxu1 %v112_v32 }
  0xde   :  { %299 = vmatmul.mubr.f32.vlgmr.msra.gmra.mrb[0].mxu1 %v113_v33 }
 0x1b1   :  { %v300_v35 = vpop.f32.mrb[0].mxu1 }
 0x1b2   :  { %v209_v36 = vadd.f32 %v300_v35, %v239_v34  ;;  %v203_v37 = vpop.f32.mrb[1].mxu1 }
 0x1b3   :  { %v204_v38 = vadd.f32 %v239_v34, %v203_v37 }
 0x1b4   :  { %v213_v39 = vmax.f32 %v209_v36, 0.0 }
 0x1b5   :  { %v212_v40 = vmax.f32 %v204_v38, 0.0 }
 0x1b6   :  { %v220_v41 = vrot.slane %v213_v39, 4 }
 0x1b7   :  { %v214_v42 = vrot.slane %v212_v40, 4 }
 0x1b8   :  { %v221_v43 = vmax.f32 %v213_v39, %v220_v41 }
 0x1b9   :  { %v215_v44 = vmax.f32 %v212_v40, %v214_v42 }
 0x1ba   :  { %v222_v45 = vrot.slane %v221_v43, 2 }
 0x1bb   :  { %v216_v46 = vrot.slane %v215_v44, 2 }
 0x1bc   :  { %v223_v47 = vmax.f32 %v221_v43, %v222_v45 }
 0x1bd   :  { %v217_v48 = vmax.f32 %v215_v44, %v216_v46 }
 0x1be   :  { %v224_v49 = vrot.slane %v223_v47, 1 }
 0x1bf   :  { %v218_v50 = vrot.slane %v217_v48, 1 }
 0x1c0   :  { %v225_v51 = vmax.f32 %v223_v47, %v224_v49 }
 0x1c1   :  { %v219_v52 = vmax.f32 %v217_v48, %v218_v50 }
 0x1c3   :  { %v229_v53 = vsel %vm228_vm1, %v225_v51, %v219_v52 }
 0x1c4   :  { %231 = vst [vmem:[%s434_s5] sm:$0x3] %v229_v53 }

</bundles_post_ra>
